<compile_context>
chip_gen: v5e
topology: v5e:2x2
jax: 0.10.0
libtpu: 0.0.40
codegen_flags: <defaults>
</compile_context>

<pallas_src>
import functools

import jax
import jax.numpy as jnp
from jax.experimental import pallas as pl
from jax.experimental.pallas import tpu as pltpu


def _round_up(x, m):
    return ((x + m - 1) // m) * m


def _cdiv(a, b):
    return -(-a // b)


def _vmem_budget():
    """Generation-keyed (footprint budget, compiler vmem limit) in bytes."""
    cap = None
    try:
        cap = getattr(pltpu.get_tpu_info(), "vmem_capacity_bytes", None)
    except Exception:
        cap = None
    if not cap:
        cap = 64 * 1024 * 1024  # conservative default: v7x-class 64 MiB per TensorCore
    budget = min(56 * 1024 * 1024, int(cap * 0.60))  # v5e/v6e -> 56 MiB, v7x -> ~38 MiB
    limit = min(96 * 1024 * 1024, int(cap * 0.75))   # v5e/v6e -> 96 MiB, v7x -> 48 MiB
    return budget, max(limit, budget)


# ---------------------------------------------------------------------------
# Kernels
# ---------------------------------------------------------------------------
def _linear_relu_kernel_resident(x_ref, w_ref, b_ref, o_ref, *, compute_dtype):
    """Full-K-resident W slab: one MXU dot per (i, j) tile, bias+ReLU fused into the store."""
    acc = jnp.dot(
        x_ref[...].astype(compute_dtype), w_ref[...],
        preferred_element_type=jnp.float32,
    )
    o_ref[...] = jnp.maximum(acc + b_ref[...], 0.0).astype(o_ref.dtype)


def _linear_relu_kernel_kred(x_ref, w_ref, b_ref, o_ref, acc_ref, *, compute_dtype):
    """K-tiled reduction: bias fused into the first partial, ReLU into the last accumulate."""
    k = pl.program_id(2)
    first = k == 0
    last = k == pl.num_programs(2) - 1
    partial = jnp.dot(
        x_ref[...].astype(compute_dtype), w_ref[...],
        preferred_element_type=jnp.float32,
    )

    @pl.when(jnp.logical_and(first, jnp.logical_not(last)))
    def _():
        acc_ref[...] = partial + b_ref[...]

    @pl.when(jnp.logical_and(jnp.logical_not(first), jnp.logical_not(last)))
    def _():
        acc_ref[...] += partial

    @pl.when(jnp.logical_and(last, jnp.logical_not(first)))
    def _():
        o_ref[...] = jnp.maximum(acc_ref[...] + partial, 0.0).astype(o_ref.dtype)

    @pl.when(jnp.logical_and(last, first))
    def _():
        o_ref[...] = jnp.maximum(partial + b_ref[...], 0.0).astype(o_ref.dtype)


# ---------------------------------------------------------------------------
# Tile planning
# ---------------------------------------------------------------------------
def _plan(M, K_pad, N, xbytes, wbytes, obytes, budget, tile_m, tile_n, tile_k):
    """Pick a plan: ('resident', tm, tn, None) or ('kred', tm, tn, tk)."""
    sub = {1: 32, 2: 16}.get(xbytes, 8)           # packed sublane multiple of x dtype
    tm = tile_m if tile_m is not None else min(512, _round_up(M, sub))
    tn = tile_n if tile_n is not None else min(1024, _round_up(N, 128))

    def fp_res(tm_, tn_):
        return (2 * tm_ * K_pad * xbytes          # x strip (double-buffered)
                + 2 * K_pad * tn_ * wbytes        # W^T full-K slab (double-buffered)
                + 2 * tm_ * tn_ * obytes          # out tile
                + 2 * tn_ * 4)                    # bias tile

    if tile_k is None:
        tm_r, tn_r = tm, tn
        if tile_n is None:
            while fp_res(tm_r, tn_r) > budget and tn_r > 256:
                tn_r = max(256, _round_up(tn_r // 2, 128))
        if tile_m is None:
            while fp_res(tm_r, tn_r) > budget and tm_r > sub:
                tm_r = max(sub, _round_up(tm_r // 2, sub))
        if tile_n is None:
            while fp_res(tm_r, tn_r) > budget and tn_r > 128:
                tn_r = max(128, _round_up(tn_r // 2, 128))
        if fp_res(tm_r, tn_r) <= budget:
            # v7x megacore: ensure >= 2 parallel blocks when the shape allows it.
            if _cdiv(M, tm_r) * _cdiv(N, tn_r) < 2:
                if tile_n is None and N > 128:
                    tn_r = max(128, _round_up(_cdiv(N, 2), 128))
                elif tile_m is None and M > sub:
                    tm_r = max(sub, _round_up(_cdiv(M, 2), sub))
            return ("resident", tm_r, tn_r, None)

    # K-tiled reduction fallback (very large K, or explicit tile_k override).
    def fp_kred(tm_, tn_, tk_):
        return (2 * tm_ * tk_ * xbytes
                + 2 * tk_ * tn_ * wbytes
                + 2 * tm_ * tn_ * obytes
                + tm_ * tn_ * 4                   # f32 accumulator scratch
                + 2 * tn_ * 4)

    if tile_n is None:
        while fp_kred(tm, tn, 128) > budget and tn > 128:
            tn = max(128, _round_up(tn // 2, 128))
    if tile_m is None:
        while fp_kred(tm, tn, 128) > budget and tm > sub:
            tm = max(sub, _round_up(tm // 2, sub))

    if tile_k is not None:
        tk = tile_k
    else:
        tk_cap = min(2048 if wbytes <= 2 else 1024, K_pad)
        tk = 128
        t = tk_cap - (tk_cap % 128)
        while t >= 128:
            if K_pad % t == 0 and fp_kred(tm, tn, t) <= budget:
                tk = t
                break
            t -= 128
    return ("kred", tm, tn, tk)


# ---------------------------------------------------------------------------
# pallas_call wrapper (weight already transposed / cast / K-padded)
# ---------------------------------------------------------------------------
@functools.partial(jax.jit, static_argnames=("tile_m", "tile_n", "tile_k"))
def _linear_relu_impl(x, w_t, bias, *, tile_m=None, tile_n=None, tile_k=None):
    """relu(x @ w_t + bias).  x: (..., K); w_t: (K_pad, N) prepacked; bias: (N,) or None."""
    *lead, K = x.shape
    K_pad, N = w_t.shape
    M = 1
    for d in lead:
        M *= d

    out_dtype = x.dtype
    cdtype = w_t.dtype
    xbytes = jnp.dtype(x.dtype).itemsize
    wbytes = jnp.dtype(cdtype).itemsize
    obytes = jnp.dtype(out_dtype).itemsize

    x2 = x.reshape(M, K)
    if K_pad != K:
        # Zero-pad K only (exact: zeros contribute nothing to the reduction).
        x2 = jnp.pad(x2, ((0, 0), (0, K_pad - K)))

    b = jnp.zeros((N,), jnp.float32) if bias is None else bias.astype(jnp.float32)
    b = b.reshape(1, N)

    budget, vmem_limit = _vmem_budget()
    plan, tm, tn, tk = _plan(M, K_pad, N, xbytes, wbytes, obytes, budget,
                             tile_m, tile_n, tile_k)

    if plan == "resident":
        # grid = (j, i) with i innermost: the W block index (0, j) is unchanged
        # across all i steps, so each W slab is DMA'd from HBM exactly once.
        grid = (_cdiv(N, tn), _cdiv(M, tm))
        out = pl.pallas_call(
            functools.partial(_linear_relu_kernel_resident, compute_dtype=cdtype),
            out_shape=jax.ShapeDtypeStruct((M, N), out_dtype),
            grid_spec=pltpu.PrefetchScalarGridSpec(
                num_scalar_prefetch=0,
                grid=grid,
                in_specs=[
                    pl.BlockSpec((tm, K_pad), lambda j, i: (i, 0)),   # x strip
                    pl.BlockSpec((K_pad, tn), lambda j, i: (0, j)),   # resident W^T slab
                    pl.BlockSpec((1, tn), lambda j, i: (0, j)),       # bias
                ],
                out_specs=pl.BlockSpec((tm, tn), lambda j, i: (i, j)),
            ),
            compiler_params=pltpu.CompilerParams(
                dimension_semantics=("parallel", "parallel"),
                vmem_limit_bytes=vmem_limit,
            ),
        )(x2, w_t, b)
    else:
        assert K_pad % tk == 0, "K tile must divide the padded K extent"
        grid = (_cdiv(M, tm), _cdiv(N, tn), K_pad // tk)
        out = pl.pallas_call(
            functools.partial(_linear_relu_kernel_kred, compute_dtype=cdtype),
            out_shape=jax.ShapeDtypeStruct((M, N), out_dtype),
            grid_spec=pltpu.PrefetchScalarGridSpec(
                num_scalar_prefetch=0,
                grid=grid,
                in_specs=[
                    pl.BlockSpec((tm, tk), lambda i, j, k: (i, k)),   # x tile
                    pl.BlockSpec((tk, tn), lambda i, j, k: (k, j)),   # W^T tile
                    pl.BlockSpec((1, tn), lambda i, j, k: (0, j)),    # bias
                ],
                out_specs=pl.BlockSpec((tm, tn), lambda i, j, k: (i, j)),
                scratch_shapes=[pltpu.VMEM((tm, tn), jnp.float32)],
            ),
            compiler_params=pltpu.CompilerParams(
                dimension_semantics=("parallel", "parallel", "arbitrary"),
                vmem_limit_bytes=vmem_limit,
            ),
        )(x2, w_t, b)

    return out.reshape(*lead, N)


# ---------------------------------------------------------------------------
# Public API
# ---------------------------------------------------------------------------
class LinearReLU:
    """Pallas analogue of `_IPEXlinearReluCPU`: y = relu(x @ W^T + b).

    The weight transpose / cast / K-padding is done ONCE at construction
    (prepacking), so repeated forward calls pay no O(K*N) HBM relayout.
    `compute_dtype=jnp.bfloat16` is the opt-in MXU fast path (f32 accumulation,
    output keeps x.dtype).
    """

    def __init__(self, weight, bias=None, compute_dtype=None):
        weight = jnp.asarray(weight)
        self.out_features, self.in_features = weight.shape
        cdtype = jnp.dtype(compute_dtype) if compute_dtype is not None else jnp.dtype(weight.dtype)
        k_pad = _round_up(self.in_features, 128)
        w_t = weight.T.astype(cdtype)                         # (K, N): lane-dense output
        if k_pad != self.in_features:
            w_t = jnp.pad(w_t, ((0, k_pad - self.in_features), (0, 0)))
        self.w_t = w_t
        self.bias = None if bias is None else jnp.asarray(bias).astype(jnp.float32)

    def __call__(self, x):
        return _linear_relu_impl(x, self.w_t, self.bias)


def linear_relu(x, weight, bias=None, *, compute_dtype=None):
    """One-shot convenience wrapper: relu(x @ weight.T + bias).

    weight is in PyTorch nn.Linear layout (N, K).  For repeated (inference)
    calls construct `LinearReLU` once instead, so the weight prepacking is
    hoisted out of the hot path.
    """
    return LinearReLU(weight, bias, compute_dtype=compute_dtype)(x)


# ---------------------------------------------------------------------------
# Self-test
# ---------------------------------------------------------------------------
if __name__ == "__main__":
    key = jax.random.PRNGKey(0)
    kx, kw, kb, kx2, kw2, kb2, kx3 = jax.random.split(key, 7)

    # nn.Linear(in_features=32, out_features=64) on a (batch=2, seq=8, hidden=32) activation.
    batch, seq, in_features, out_features = 2, 8, 32, 64
    x = jax.random.normal(kx, (batch, seq, in_features), dtype=jnp.float32)
    weight = jax.random.normal(kw, (out_features, in_features), dtype=jnp.float32) * 0.1
    bias = jax.random.normal(kb, (out_features,), dtype=jnp.float32) * 0.1

    # Module-style usage: weight is prepacked once.
    mod = LinearReLU(weight, bias)
    y = jax.block_until_ready(mod(x))
    y_ref = jnp.maximum(x @ weight.T + bias, 0.0)
    assert y.shape == (batch, seq, out_features)
    assert jnp.allclose(y, y_ref, atol=1e-5, rtol=1e-5)

    # No-bias path.
    y_nb = jax.block_until_ready(LinearReLU(weight)(x))
    assert jnp.allclose(y_nb, jnp.maximum(x @ weight.T, 0.0), atol=1e-5, rtol=1e-5)

    # Ragged (non-(8,128)-aligned) shapes exercise the cdiv / edge-block path
    # (no M/N padding, exact out_shape).
    M2, K2, N2 = 13, 200, 300
    x_odd = jax.random.normal(kx2, (M2, K2), dtype=jnp.float32)
    w_odd = jax.random.normal(kw2, (N2, K2), dtype=jnp.float32) * 0.05
    b_odd = jax.random.normal(kb2, (N2,), dtype=jnp.float32) * 0.05
    y_odd = jax.block_until_ready(linear_relu(x_odd, w_odd, b_odd))
    y_odd_ref = jnp.maximum(x_odd @ w_odd.T + b_odd, 0.0)
    assert y_odd.shape == (M2, N2)
    assert jnp.allclose(y_odd, y_odd_ref, atol=1e-4, rtol=1e-4)

    # bf16 compute fast path (f32 accumulation, f32 output) -- looser tolerance.
    y_bf16 = jax.block_until_ready(LinearReLU(weight, bias, compute_dtype=jnp.bfloat16)(x))
    assert jnp.allclose(y_bf16, y_ref, atol=5e-2, rtol=5e-2)

    # Force the K-tiled reduction kernel (normally only used for very large K)
    # at a small shape so that path is validated too.
    M3, K3, N3 = 16, 384, 256
    x_big = jax.random.normal(kx3, (M3, K3), dtype=jnp.float32)
    w_big = jax.random.normal(kw, (N3, K3), dtype=jnp.float32) * 0.05
    b_big = jax.random.normal(kb, (N3,), dtype=jnp.float32) * 0.05
    mod3 = LinearReLU(w_big, b_big)
    y_big = jax.block_until_ready(_linear_relu_impl(x_big, mod3.w_t, mod3.bias, tile_k=128))
    y_big_ref = jnp.maximum(x_big @ w_big.T + b_big, 0.0)
    assert jnp.allclose(y_big, y_big_ref, atol=1e-4, rtol=1e-4)

    print("KERNEL_OK")
</pallas_src>

<mosaic_0001>
module attributes {stable_mosaic.version = 11 : i64} {
  func.func @_linear_relu_kernel_resident(%arg0: i32, %arg1: i32, %arg2: memref<8x128xf32, #tpu.memory_space<vmem>>, %arg3: memref<128x128xf32, #tpu.memory_space<vmem>>, %arg4: memref<1x128xf32, #tpu.memory_space<vmem>>, %arg5: memref<8x128xf32, #tpu.memory_space<vmem>>) attributes {dimension_semantics = [#tpu.dimension_semantics<parallel>, #tpu.dimension_semantics<parallel>], iteration_bounds = array<i64: 1, 2>, scalar_prefetch = 0 : i64, scratch_operands = 0 : i64, tpu.core_type = #tpu.core_type<tc>, window_params = [{transform_indices = @transform_0, window_bounds = array<i64: 8, 128>}, {transform_indices = @transform_1, window_bounds = array<i64: 128, 128>}, {transform_indices = @transform_2, window_bounds = array<i64: 1, 128>}, {transform_indices = @transform_3, window_bounds = array<i64: 8, 128>}]} {
    %c0 = arith.constant 0 : index
    %c0_0 = arith.constant 0 : index
    %0 = vector.load %arg2[%c0, %c0_0] : memref<8x128xf32, #tpu.memory_space<vmem>>, vector<8x128xf32>
    %c0_1 = arith.constant 0 : index
    %c0_2 = arith.constant 0 : index
    %1 = vector.load %arg3[%c0_1, %c0_2] : memref<128x128xf32, #tpu.memory_space<vmem>>, vector<128x128xf32>
    %cst = arith.constant dense<0.000000e+00> : vector<8x128xf32>
    %2 = tpu.matmul %0, %1, %cst {dimension_numbers = #tpu.dot_dimension_numbers<[1], [0], [0], [1], [0, 0, 1, 1], [], []>} : vector<8x128xf32>, vector<128x128xf32>, vector<8x128xf32> -> vector<8x128xf32>
    %c0_3 = arith.constant 0 : index
    %c0_4 = arith.constant 0 : index
    %3 = vector.load %arg4[%c0_3, %c0_4] : memref<1x128xf32, #tpu.memory_space<vmem>>, vector<1x128xf32>
    %4 = vector.broadcast %3 : vector<1x128xf32> to vector<8x128xf32>
    %5 = arith.addf %2, %4 : vector<8x128xf32>
    %cst_5 = arith.constant 0.000000e+00 : f32
    %6 = vector.broadcast %cst_5 : f32 to vector<8x128xf32>
    %7 = arith.maximumf %5, %6 : vector<8x128xf32>
    %c0_6 = arith.constant 0 : index
    %c0_7 = arith.constant 0 : index
    %8 = vector.load %arg5[%c0_6, %c0_7] : memref<8x128xf32, #tpu.memory_space<vmem>>, vector<8x128xf32>
    tpu.vector_store %arg5[%c0_6, %c0_7], %7 {strides = array<i32>} : memref<8x128xf32, #tpu.memory_space<vmem>>, vector<8x128xf32>,
    return
  }
  func.func @transform_0(%arg0: i32, %arg1: i32) -> (i32, i32) {
    %c0_i32 = arith.constant 0 : i32
    %c0_i32_0 = arith.constant 0 : i32
    return %arg1, %c0_i32 : i32, i32
  }
  func.func @transform_1(%arg0: i32, %arg1: i32) -> (i32, i32) {
    %c0_i32 = arith.constant 0 : i32
    %c0_i32_0 = arith.constant 0 : i32
    return %c0_i32, %arg0 : i32, i32
  }
  func.func @transform_2(%arg0: i32, %arg1: i32) -> (i32, i32) {
    %c0_i32 = arith.constant 0 : i32
    %c0_i32_0 = arith.constant 0 : i32
    return %c0_i32, %arg0 : i32, i32
  }
  func.func @transform_3(%arg0: i32, %arg1: i32) -> (i32, i32) {
    %c0_i32 = arith.constant 0 : i32
    return %arg1, %arg0 : i32, i32
  }
}

</mosaic_0001>

<bundles_post_ra>
// kernel: _linear_relu_impl.1
= control target key start
LH: loop header
LB: loop body
LE: loop exit
PB: predicated region body
PF: predicated region fallthrough
CT: control target
= control target key end

     0   :  { %8 = vsyncpa [#allocation3], 0  ;;  %s683_s0 = inlined_call_operand.vmem [shape: f32[16,128], index: 0, kind: input, shape index: {}]   ;;  %s684_s1 = inlined_call_operand.vmem [shape: f32[128,64], index: 1, kind: input, shape index: {}]   ;;  %s685_s2 = inlined_call_operand.vmem [shape: f32[1,64], index: 2, kind: input, shape index: {}]   ;;  %s686_s3 = inlined_call_operand.hbm [shape: f32[16,64], index: 3, kind: output, shape index: {}]  }
   0x1   :  { %10 = vsyncpa [#allocation3 + $0x1], 0  ;;  %s535_s12 = smov 0   ;;  %s537_s13 = smov 0  }
   0x2   :  { %s539_s14 = smov 0   ;;  %s541_s15 = smov 0  }
   0x3   :  { %s543_s16 = smov 0   ;;  %s545_s17 = smov 0  }
   0x4 LB: > { %s366_s18 = sadd.s32 4294967295, %s513_s17   ;;  %s367_s19 = sadd.s32 4294967294, %s513_s17   ;;  %s513_s17 = sphi %s545_s17, %s16_s17   ;;  %s509_s16 = sphi %s543_s16, %s693_s16   ;;  %s505_s15 = sphi %s541_s15, %s692_s15   ;;  %s501_s14 = sphi %s539_s14, %s691_s14   ;;  %s497_s13 = sphi %s537_s13, %s690_s13   ;;  %s493_s12 = sphi %s535_s12, %s689_s12  }
   0x5   : > { %s25_s20 = sadd.s32 1, %s509_s16  ;;  %s115_s21 = sadd.s32 1, %s501_s14 }
   0x6   : > { %p26_p0 = scmp.ge.s32.totalorder %s25_s20, 2  ;;  %p125_p1 = scmp.ne.s32.totalorder %s501_s14, %s497_s13 }
   0x7   : > { %p126_p2 = scmp.eq.s32.totalorder %s366_s18, 1  ;;  %p131_p3 = scmp.ne.s32.totalorder %s497_s13, %s493_s12 }
   0x8   : > { %s695_s20 = smov (%p26_p0, %s25_s20), 0  ;;  %p132_p5 = scmp.eq.s32.totalorder %s367_s19, 1 }
   0x9   : > { %p575_p4 = por %p126_p2, %p125_p1  ;;  %s110_s23 = ssub.s32 %s509_s16, %s695_s20 }
   0xa   : > { %p372_p6 = scmp.ge.s32.totalorder %s513_s17, 1  ;;  %p113_p7 = scmp.eq.s32.totalorder %s110_s23, 0 }
   0xb   : > { %p582_p8 = por %p132_p5, %p131_p3  ;;  %p170_p9 = scmp.lt.s32.totalorder %s513_s17, 3 }
   0xc   : > { %s588_s25 = scalar_select %p113_p7, %s501_s14, %s115_s21  }
   0xd   : > { %p171_p10 = pnand %p372_p6, %p170_p9 }
   0xe   : > { %p200_p11 = scmp.lt.s32.totalorder (!%p171_p10), %s505_s15, 1  ;;  %s197_s29 = sand.u32 (!%p171_p10), 1, %s497_s13  }
   0xf   : > { %174 = sbr.rel (%p171_p10) target bundleno = 185 (0xb9), region = 32  ;;  %s373_s30 = sshll.u32 (!%p171_p10), %s197_s29, 3 }
  0x10   : > { %s199_s10 = scalar_lea.vmem (!%p171_p10), [#allocation2], %s373_s30  ;;  %s255_s19 = scalar_lea.sflag (!%p171_p10), [#allocation3], %s197_s29 }
  0x11   : > { %s268_s11 = sshll.u32 (!%p171_p10), %s199_s10, 4  ;;  %s455_s27 = scalar_lea.hbm (!%p171_p10), %s686_s3, 16  ;;  %s269_s11 = int_to_ptr.vmem [resolvable:$true] %s268_s11 }
  0x14   : > { %v227_v0 = vld [vmem:[%s684_s1 + $0x78] sm:$0xff]  ;;  %v226_v1 = vld [vmem:[%s684_s1 + $0x70] sm:$0xff]  ;;  %v225_v2 = vld [vmem:[%s684_s1 + $0x68] sm:$0xff]  ;;  %s201_s4 = scalar_select %p200_p11, %s505_s15, 1 }
  0x15   : > { %232 = vmatpush.msra.mxu0 %v227_v0  ;;  %v224_v3 = vld [vmem:[%s684_s1 + $0x60] sm:$0xff]  ;;  %v223_v4 = vld [vmem:[%s684_s1 + $0x58] sm:$0xff]  ;;  %v222_v5 = vld [vmem:[%s684_s1 + $0x50] sm:$0xff] }
  0x16   : > { %v221_v6 = vld [vmem:[%s684_s1 + $0x48] sm:$0xff]  ;;  %v220_v7 = vld [vmem:[%s684_s1 + $0x40] sm:$0xff]  ;;  %v219_v8 = vld [vmem:[%s684_s1 + $0x38] sm:$0xff]  ;;  %s374_s9 = sshll.u32 %s201_s4, 3  ;;  %s376_s4 = sshll.u32 %s505_s15, 3 }
  0x17   : > { %233 = vmatpush.msra.mxu0 %v226_v1  ;;  %v218_v9 = vld [vmem:[%s684_s1 + $0x30] sm:$0xff]  ;;  %v217_v10 = vld [vmem:[%s684_s1 + $0x28] sm:$0xff]  ;;  %v216_v11 = vld [vmem:[%s684_s1 + $0x20] sm:$0xff]  ;;  %s203_s26 = scalar_lea.vmem %s683_s0, %s374_s9  ;;  %s266_s9 = scalar_lea.hbm %s686_s3, %s376_s4 }
  0x18   : > { %v215_v12 = vld [vmem:[%s684_s1 + $0x18] sm:$0xff]  ;;  %v214_v13 = vld [vmem:[%s684_s1 + $0x10] sm:$0xff]  ;;  %v213_v14 = vld [vmem:[%s684_s1 + $0x8] sm:$0xff]  ;;  %s270_s18 = sshll.u32 %s266_s9, 4  ;;  %s271_s18 = int_to_ptr.hbm [resolvable:$true] %s270_s18 }
  0x19   : > { %234 = vmatpush.msra.mxu0 %v225_v2  ;;  %v212_v15 = vld [vmem:[%s684_s1] sm:$0xff]  ;;  %s449_s15 = sshra.s32 %s271_s18, 4  ;;  %s450_s15 = int_to_ptr.hbm [resolvable:$true] %s449_s15 }
  0x1a   : > { %v211_v16 = vld [vmem:[%s203_s26] sm:$0xff]  ;;  %s451_s21 = scalar_lea.hbm %s450_s15, 8  ;;  %p456_p1 = scmp.lt.s32.totalorder %s450_s15, %s686_s3 }
  0x1b   : > { %235 = vmatpush.msra.mxu0 %v224_v3  ;;  %v434_v17 = vld [vmem:[%s685_s2] ss:$0 sm:$0xff]  ;;  %p452_p12 = scmp.ne.s32.totalorder %s450_s15, %s451_s21  ;;  %p457_p2 = scmp.lt.s32.totalorder %s455_s27, %s451_s21 }
  0x1d   : > { %236 = vmatpush.msra.mxu0 %v223_v4  ;;  %p453_p13 = pnand %p452_p12, %p575_p4  ;;  %p458_p3 = por %p457_p2, %p456_p1 }
  0x1f   : > { %237 = vmatpush.msra.mxu0 %v222_v5  ;;  %p454_p0 = pneg %p453_p13 }
  0x21   : > { %238 = vmatpush.msra.mxu0 %v221_v6  ;;  %p459_p5 = pnand %p458_p3, %p454_p0 }
  0x23   : > { %239 = vmatpush.msra.mxu0 %v220_v7 }
  0x25   : > { %240 = vmatpush.msra.mxu0 %v219_v8 }
  0x27   : > { %241 = vmatpush.msra.mxu0 %v218_v9 }
  0x29   : > { %242 = vmatpush.msra.mxu0 %v217_v10 }
  0x2b   : > { %243 = vmatpush.msra.mxu0 %v216_v11 }
  0x2d   : > { %244 = vmatpush.msra.mxu0 %v215_v12 }
  0x2f   : > { %245 = vmatpush.msra.mxu0 %v214_v13 }
  0x31   : > { %246 = vmatpush.msra.mxu0 %v213_v14 }
  0x33   : > { %247 = vmatpush.msra.mxu0 %v212_v15 }
  0x34   : > { %248 = vmatmul.f32.vlgmr.msra.gmra.mxu0 %v211_v16 }
  0xb1   : > { %v249_v18 = vpop.f32.mrf.mxu0 }
  0xb2   : > { %v250_v19 = vadd.f32 %v434_v17, %v249_v18 }
  0xb4   : > { %v252_v20 = vmax.f32 %v250_v19, 0.0 }
  0xb6   : > { %253 = vst [vmem:[%s199_s10] sm:$0xff] %v252_v20 }
  0xb7   : > { %462 = shalt.err (!%p459_p5)
}
  0xb8   : > { %379 = dma.vmem_to_hbm [thread:$0]  (%p575_p4), %s269_s11, 128, %s271_s18, %s255_s19  }
  0xb9 PF: > { %p385_p6 = scmp.ge.s32.totalorder %s513_s17, 2  ;;  %s282_s29 = sand.u32 1, %s493_s12  }
  0xba   : > { %s283_s4 = scalar_lea.sflag [#allocation3], %s282_s29 }
  0xbb   : > { %p382_p7 = pnand %p385_p6, %p582_p8 }
  0xbd   : > { %p383_p9 = pneg %p382_p7 }
  0xbf   : > { %488 = dma.done.wait (%p383_p9), %s283_s4, 128  }
  0xc0   : > { %490 = vsyncadd (%p383_p9), %s283_s4, 4294967168  ;;  %s16_s17 = sadd.s32 1, %s513_s17   ;;  %s689_s12 = smov %s497_s13 }
  0xc1   : > { %p13_p10 = scmp.ge.s32.totalorder %s16_s17, 4   ;;  %s690_s13 = smov %s501_s14 }
  0xc2   : > { %s691_s14 = smov %s588_s25  ;;  %s692_s15 = smov %s509_s16 }
  0xc3   : > { %s693_s16 = smov %s695_s20  ;;  %15 = sbr.rel (!%p13_p10) target bundleno = 4 (0x4), region = 73 }
  0xc8   :  { %289 = vsyncpa [#allocation3], 1 }
  0xc9   :  { %291 = vsyncpa [#allocation3 + $0x1], 1 }

</bundles_post_ra>
